<compile_context>
chip_gen: v7x
topology: tpu7x:2x2x1
jax: 0.10.0
libtpu: 0.0.40
codegen_flags: <defaults>
</compile_context>

<pallas_src>
import jax
import jax.numpy as jnp
from jax.experimental import pallas as pl
from jax.experimental.pallas import tpu as pltpu


# ----------------------------------------------------------------------------
# Fused kernel (one grid step == one batch tile of BT elements):
#   one-hot ids @ fused(emb@enc_w) -> tanh  -> block-diag-mask matmul (mean
#   pooling of caption+threshold) -> concat_vectors(('u','v','|u-v|')) ->
#   pred_layer (Linear -> ReLU -> Linear(.,1)) -> lane-dense logit slab.
# ----------------------------------------------------------------------------
def tsn_fused_kernel(ids_ref, maskblk_ref, tbl_ref, enc_b_ref,
                     w1_ref, b1_ref, w2_ref, b2_ref, out_ref):
    R = ids_ref.shape[0]           # 2 * BT * S token rows in this tile
    V = tbl_ref.shape[0]
    BT = out_ref.shape[0]          # batch tile (8)

    # ---- embedding lookup fused with encoder Linear ------------------------
    # table_fused == emb_table @ enc_w, so one_hot @ table_fused == emb @ enc_w.
    ids = ids_ref[...]                                            # [R, 1] int32
    vocab_iota = jax.lax.broadcasted_iota(jnp.int32, (R, V), 1)
    one_hot = (ids == vocab_iota).astype(jnp.bfloat16)            # [R, V]
    hidden = jnp.tanh(
        jnp.dot(one_hot, tbl_ref[...], preferred_element_type=jnp.float32)
        + enc_b_ref[...])                                         # [R, H] f32 (tanh on f32)

    # ---- fused masked-mean pooling: ONE MXU push ----------------------------
    # maskblk already block-diagonal and scaled by 1/clamp(count, 1e-9).
    pooled = jnp.dot(maskblk_ref[...], hidden.astype(jnp.bfloat16),
                     preferred_element_type=jnp.float32)          # [2*BT, H]
    u = pooled[:BT]                                               # caption means
    v = pooled[BT:]                                               # threshold means

    # ---- concat_vectors(('u','v','|u-v|')) + pred_layer ---------------------
    feat = jnp.concatenate([u, v, jnp.abs(u - v)], axis=-1)       # [BT, 3H] (3H<=128 lanes)
    z = jnp.dot(feat.astype(jnp.bfloat16), w1_ref[...],
                preferred_element_type=jnp.float32) + b1_ref[...] # [BT, P]
    z = jnp.maximum(z, 0.0)                                       # ReLU
    # final Linear(P, 1) as VPU multiply + lane reduction (N=1 MXU is waste).
    logit = jnp.sum(z * w2_ref[...], axis=-1, keepdims=True) + b2_ref[...]   # [BT, 1]

    # full (BT,128) lane-dense store -> unmasked vst.
    out_ref[...] = jnp.broadcast_to(logit, out_ref.shape)


# ----------------------------------------------------------------------------
# Wrapper (same_encoder=True: chunk_encoder is prompt_encoder, shared weights)
# ----------------------------------------------------------------------------
def tsn_forward(params, caption_ids, caption_mask, threshold_ids, threshold_mask,
                *, batch_tile=8):
    B, S = caption_ids.shape
    V, E = params["emb_table"].shape
    H = params["enc_w"].shape[1]
    P = params["w1"].shape[1]

    BT = batch_tile
    G = (B + BT - 1) // BT                     # number of batch tiles (1 here)
    BP = G * BT
    pad_b = BP - B
    R = 2 * BT * S                             # token rows per tile

    # ---- pre-fuse embedding table with encoder weight (exact: tanh after) ---
    table_fused = (params["emb_table"].astype(jnp.float32)
                   @ params["enc_w"].astype(jnp.float32)).astype(jnp.bfloat16)   # [V, H]
    enc_b = params["enc_b"].astype(jnp.float32)                                  # [1, H]
    w1 = params["w1"].astype(jnp.bfloat16)                                       # [3H, P]
    b1 = params["b1"].astype(jnp.float32)                                        # [1, P]
    w2_row = params["w2"].T.astype(jnp.float32)                                  # [1, P]
    b2 = params["b2"].astype(jnp.float32)                                        # [1, 1]

    # ---- pad batch to tile multiple and pre-stack ids / masks ---------------
    def pad_batch(x):
        return jnp.pad(x, ((0, pad_b), (0, 0)))
    cap_ids = pad_batch(caption_ids.astype(jnp.int32))        # [BP, S]
    thr_ids = pad_batch(threshold_ids.astype(jnp.int32))
    cap_mask = pad_batch(caption_mask.astype(jnp.float32))
    thr_mask = pad_batch(threshold_mask.astype(jnp.float32))

    # per-tile row order: [caption tokens of BT batches | threshold tokens].
    cap_ids_t = cap_ids.reshape(G, BT * S)
    thr_ids_t = thr_ids.reshape(G, BT * S)
    ids_all = jnp.concatenate([cap_ids_t, thr_ids_t], axis=1).reshape(G * R, 1)

    # block-diagonal pooled-mean mask (1/count folded in -> one matmul pools).
    def scale(m):                                              # [BP, S]
        cnt = jnp.clip(jnp.sum(m, axis=-1, keepdims=True), 1e-9, None)
        return m / cnt
    eye_bt = jnp.eye(BT, dtype=jnp.float32)                    # [BT, BT]
    cap_m = scale(cap_mask).reshape(G, BT, S)
    thr_m = scale(thr_mask).reshape(G, BT, S)
    cap_blk = (cap_m[:, :, None, :] * eye_bt[None, :, :, None]).reshape(G, BT, BT * S)
    thr_blk = (thr_m[:, :, None, :] * eye_bt[None, :, :, None]).reshape(G, BT, BT * S)
    zeros_half = jnp.zeros((G, BT, BT * S), jnp.float32)
    mask_block = jnp.concatenate(
        [jnp.concatenate([cap_blk, zeros_half], axis=-1),      # rows 0..BT-1   -> u
         jnp.concatenate([zeros_half, thr_blk], axis=-1)],     # rows BT..2BT-1 -> v
        axis=1).reshape(G * 2 * BT, R).astype(jnp.bfloat16)    # pre-cast: no in-kernel cast

    out_padded = pl.pallas_call(
        tsn_fused_kernel,
        out_shape=jax.ShapeDtypeStruct((G * BT, 128), jnp.float32),
        grid=(G,),
        in_specs=[
            pl.BlockSpec((R, 1), lambda i: (i, 0)),            # stacked token ids
            pl.BlockSpec((2 * BT, R), lambda i: (i, 0)),       # scaled block-diag mask
            pl.BlockSpec((V, H), lambda i: (0, 0)),            # fused emb@enc_w table
            pl.BlockSpec((1, H), lambda i: (0, 0)),            # encoder bias
            pl.BlockSpec((3 * H, P), lambda i: (0, 0)),        # pred Linear 1
            pl.BlockSpec((1, P), lambda i: (0, 0)),
            pl.BlockSpec((1, P), lambda i: (0, 0)),            # pred Linear 2 (row) + bias
            pl.BlockSpec((1, 1), lambda i: (0, 0)),
        ],
        out_specs=pl.BlockSpec((BT, 128), lambda i: (i, 0)),
        compiler_params=pltpu.CompilerParams(
            # batch tiles split across v7x's 2 TensorCores once G > 1.
            dimension_semantics=("parallel",),
        ),
    )(ids_all, mask_block, table_fused, enc_b, w1, b1, w2_row, b2)

    # rows [:B], lane 0 hold the logits; matches torch `.squeeze()` semantics.
    return jnp.squeeze(out_padded[:B, :1])


def init_params(key, vocab=64, embed=32, hidden=32, pred_hidden=32):
    k = jax.random.split(key, 6)
    scale = 0.1
    return {
        "emb_table": scale * jax.random.normal(k[0], (vocab, embed), jnp.float32),
        "enc_w": scale * jax.random.normal(k[1], (embed, hidden), jnp.float32),
        "enc_b": scale * jax.random.normal(k[2], (1, hidden), jnp.float32),
        # pred_layer = Linear(3*hidden, pred_hidden) -> ReLU -> Linear(pred_hidden, 1)
        "w1": scale * jax.random.normal(k[3], (3 * hidden, pred_hidden), jnp.float32),
        "b1": scale * jax.random.normal(k[4], (1, pred_hidden), jnp.float32),
        "w2": scale * jax.random.normal(k[5], (pred_hidden, 1), jnp.float32),
        "b2": jnp.zeros((1, 1), jnp.float32),
    }


if __name__ == "__main__":
    key = jax.random.PRNGKey(0)
    pk, ck, tk = jax.random.split(key, 3)

    B, S, VOCAB = 2, 8, 64
    params = init_params(pk, vocab=VOCAB, embed=32, hidden=32, pred_hidden=32)

    caption_ids = jax.random.randint(ck, (B, S), 0, VOCAB, dtype=jnp.int32)
    threshold_ids = jax.random.randint(tk, (B, S), 0, VOCAB, dtype=jnp.int32)

    # deterministic padding masks (1 = real token, 0 = pad)
    pos = jnp.arange(S)[None, :]
    caption_mask = (pos < jnp.array([[8], [5]])).astype(jnp.int32)     # [B, S]
    threshold_mask = (pos < jnp.array([[6], [8]])).astype(jnp.int32)   # [B, S]

    out = tsn_forward(params, caption_ids, caption_mask,
                      threshold_ids, threshold_mask)
    out = jax.block_until_ready(out)
    assert out.shape == (B,), out.shape
    print("KERNEL_OK")
</pallas_src>

<mosaic_0001>
module attributes {stable_mosaic.version = 11 : i64} {
  func.func @tsn_fused_kernel(%arg0: i32, %arg1: memref<128x1xi32, #tpu.memory_space<vmem>>, %arg2: memref<16x128xbf16, #tpu.memory_space<vmem>>, %arg3: memref<64x32xbf16, #tpu.memory_space<vmem>>, %arg4: memref<1x32xf32, #tpu.memory_space<vmem>>, %arg5: memref<96x32xbf16, #tpu.memory_space<vmem>>, %arg6: memref<1x32xf32, #tpu.memory_space<vmem>>, %arg7: memref<1x32xf32, #tpu.memory_space<vmem>>, %arg8: memref<1x1xf32, #tpu.memory_space<vmem>>, %arg9: memref<8x128xf32, #tpu.memory_space<vmem>>) attributes {dimension_semantics = [#tpu.dimension_semantics<parallel>], iteration_bounds = array<i64: 1>, scalar_prefetch = 0 : i64, scratch_operands = 0 : i64, tpu.core_type = #tpu.core_type<tc>, window_params = [{transform_indices = @transform_0, window_bounds = array<i64: 128, 1>}, {transform_indices = @transform_1, window_bounds = array<i64: 16, 128>}, {pipeline_mode = #tpu.pipeline_mode<synchronous>, transform_indices = @transform_2, window_bounds = array<i64: 64, 32>}, {pipeline_mode = #tpu.pipeline_mode<synchronous>, transform_indices = @transform_3, window_bounds = array<i64: 1, 32>}, {pipeline_mode = #tpu.pipeline_mode<synchronous>, transform_indices = @transform_4, window_bounds = array<i64: 96, 32>}, {pipeline_mode = #tpu.pipeline_mode<synchronous>, transform_indices = @transform_5, window_bounds = array<i64: 1, 32>}, {pipeline_mode = #tpu.pipeline_mode<synchronous>, transform_indices = @transform_6, window_bounds = array<i64: 1, 32>}, {pipeline_mode = #tpu.pipeline_mode<synchronous>, transform_indices = @transform_7, window_bounds = array<i64: 1, 1>}, {transform_indices = @transform_8, window_bounds = array<i64: 8, 128>}]} {
    %c0 = arith.constant 0 : index
    %c0_0 = arith.constant 0 : index
    %0 = vector.load %arg1[%c0, %c0_0] : memref<128x1xi32, #tpu.memory_space<vmem>>, vector<128x1xi32>
    %1 = tpu.iota {dimensions = array<i32: 1>} : vector<128x64xi32>
    %2 = vector.broadcast %0 : vector<128x1xi32> to vector<128x64xi32>
    %3 = arith.cmpi eq, %2, %1 : vector<128x64xi32>
    %4 = arith.extui %3 : vector<128x64xi1> to vector<128x64xi32>
    %5 = arith.sitofp %4 : vector<128x64xi32> to vector<128x64xf32>
    %6 = arith.truncf %5 : vector<128x64xf32> to vector<128x64xbf16>
    %c0_1 = arith.constant 0 : index
    %c0_2 = arith.constant 0 : index
    %7 = vector.load %arg3[%c0_1, %c0_2] : memref<64x32xbf16, #tpu.memory_space<vmem>>, vector<64x32xbf16>
    %cst = arith.constant dense<0.000000e+00> : vector<128x32xf32>
    %8 = tpu.matmul %6, %7, %cst {dimension_numbers = #tpu.dot_dimension_numbers<[1], [0], [0], [1], [0, 0, 1, 1], [], []>} : vector<128x64xbf16>, vector<64x32xbf16>, vector<128x32xf32> -> vector<128x32xf32>
    %c0_3 = arith.constant 0 : index
    %c0_4 = arith.constant 0 : index
    %9 = vector.load %arg4[%c0_3, %c0_4] : memref<1x32xf32, #tpu.memory_space<vmem>>, vector<1x32xf32>
    %10 = vector.broadcast %9 : vector<1x32xf32> to vector<128x32xf32>
    %11 = arith.addf %8, %10 : vector<128x32xf32>
    %12 = math.tanh %11 : vector<128x32xf32>
    %c0_5 = arith.constant 0 : index
    %c0_6 = arith.constant 0 : index
    %13 = vector.load %arg2[%c0_5, %c0_6] : memref<16x128xbf16, #tpu.memory_space<vmem>>, vector<16x128xbf16>
    %14 = arith.truncf %12 : vector<128x32xf32> to vector<128x32xbf16>
    %cst_7 = arith.constant dense<0.000000e+00> : vector<16x32xf32>
    %15 = tpu.matmul %13, %14, %cst_7 {dimension_numbers = #tpu.dot_dimension_numbers<[1], [0], [0], [1], [0, 0, 1, 1], [], []>} : vector<16x128xbf16>, vector<128x32xbf16>, vector<16x32xf32> -> vector<16x32xf32>
    %16 = vector.extract_strided_slice %15 {offsets = [0, 0], sizes = [8, 32], strides = [1, 1]} : vector<16x32xf32> to vector<8x32xf32>
    %17 = vector.extract_strided_slice %15 {offsets = [8, 0], sizes = [8, 32], strides = [1, 1]} : vector<16x32xf32> to vector<8x32xf32>
    %18 = arith.subf %16, %17 : vector<8x32xf32>
    %19 = math.absf %18 : vector<8x32xf32>
    %20 = tpu.concatenate %16, %17, %19 in 1 : vector<8x32xf32>, vector<8x32xf32>, vector<8x32xf32> -> vector<8x96xf32>
    %21 = arith.truncf %20 : vector<8x96xf32> to vector<8x96xbf16>
    %c0_8 = arith.constant 0 : index
    %c0_9 = arith.constant 0 : index
    %22 = vector.load %arg5[%c0_8, %c0_9] : memref<96x32xbf16, #tpu.memory_space<vmem>>, vector<96x32xbf16>
    %cst_10 = arith.constant dense<0.000000e+00> : vector<8x32xf32>
    %23 = tpu.matmul %21, %22, %cst_10 {dimension_numbers = #tpu.dot_dimension_numbers<[1], [0], [0], [1], [0, 0, 1, 1], [], []>} : vector<8x96xbf16>, vector<96x32xbf16>, vector<8x32xf32> -> vector<8x32xf32>
    %c0_11 = arith.constant 0 : index
    %c0_12 = arith.constant 0 : index
    %24 = vector.load %arg6[%c0_11, %c0_12] : memref<1x32xf32, #tpu.memory_space<vmem>>, vector<1x32xf32>
    %25 = vector.broadcast %24 : vector<1x32xf32> to vector<8x32xf32>
    %26 = arith.addf %23, %25 : vector<8x32xf32>
    %cst_13 = arith.constant 0.000000e+00 : f32
    %27 = vector.broadcast %cst_13 : f32 to vector<8x32xf32>
    %28 = arith.maximumf %26, %27 : vector<8x32xf32>
    %c0_14 = arith.constant 0 : index
    %c0_15 = arith.constant 0 : index
    %29 = vector.load %arg7[%c0_14, %c0_15] : memref<1x32xf32, #tpu.memory_space<vmem>>, vector<1x32xf32>
    %30 = vector.broadcast %29 : vector<1x32xf32> to vector<8x32xf32>
    %31 = arith.mulf %28, %30 : vector<8x32xf32>
    %cst_16 = arith.constant dense<0.000000e+00> : vector<8xf32>
    %32 = vector.multi_reduction <add>, %31, %cst_16 [1] : vector<8x32xf32> to vector<8xf32>
    %33 = vector.shape_cast %32 : vector<8xf32> to vector<8x1xf32>
    %c0_17 = arith.constant 0 : index
    %c0_18 = arith.constant 0 : index
    %34 = vector.load %arg8[%c0_17, %c0_18] : memref<1x1xf32, #tpu.memory_space<vmem>>, vector<1x1xf32>
    %35 = vector.broadcast %34 : vector<1x1xf32> to vector<8x1xf32>
    %36 = arith.addf %33, %35 : vector<8x1xf32>
    %37 = vector.shape_cast %36 : vector<8x1xf32> to vector<8x1xf32>
    %38 = vector.broadcast %37 : vector<8x1xf32> to vector<8x128xf32>
    %c0_19 = arith.constant 0 : index
    %c0_20 = arith.constant 0 : index
    %39 = vector.load %arg9[%c0_19, %c0_20] : memref<8x128xf32, #tpu.memory_space<vmem>>, vector<8x128xf32>
    tpu.vector_store %arg9[%c0_19, %c0_20], %38 {strides = array<i32>} : memref<8x128xf32, #tpu.memory_space<vmem>>, vector<8x128xf32>,
    return
  }
  func.func @transform_0(%arg0: i32) -> (i32, i32) {
    %c0_i32 = arith.constant 0 : i32
    %c0_i32_0 = arith.constant 0 : i32
    return %arg0, %c0_i32 : i32, i32
  }
  func.func @transform_1(%arg0: i32) -> (i32, i32) {
    %c0_i32 = arith.constant 0 : i32
    %c0_i32_0 = arith.constant 0 : i32
    return %arg0, %c0_i32 : i32, i32
  }
  func.func @transform_2(%arg0: i32) -> (i32, i32) {
    %c0_i32 = arith.constant 0 : i32
    %c0_i32_0 = arith.constant 0 : i32
    %c0_i32_1 = arith.constant 0 : i32
    return %c0_i32, %c0_i32_0 : i32, i32
  }
  func.func @transform_3(%arg0: i32) -> (i32, i32) {
    %c0_i32 = arith.constant 0 : i32
    %c0_i32_0 = arith.constant 0 : i32
    %c0_i32_1 = arith.constant 0 : i32
    return %c0_i32, %c0_i32_0 : i32, i32
  }
  func.func @transform_4(%arg0: i32) -> (i32, i32) {
    %c0_i32 = arith.constant 0 : i32
    %c0_i32_0 = arith.constant 0 : i32
    %c0_i32_1 = arith.constant 0 : i32
    return %c0_i32, %c0_i32_0 : i32, i32
  }
  func.func @transform_5(%arg0: i32) -> (i32, i32) {
    %c0_i32 = arith.constant 0 : i32
    %c0_i32_0 = arith.constant 0 : i32
    %c0_i32_1 = arith.constant 0 : i32
    return %c0_i32, %c0_i32_0 : i32, i32
  }
  func.func @transform_6(%arg0: i32) -> (i32, i32) {
    %c0_i32 = arith.constant 0 : i32
    %c0_i32_0 = arith.constant 0 : i32
    %c0_i32_1 = arith.constant 0 : i32
    return %c0_i32, %c0_i32_0 : i32, i32
  }
  func.func @transform_7(%arg0: i32) -> (i32, i32) {
    %c0_i32 = arith.constant 0 : i32
    %c0_i32_0 = arith.constant 0 : i32
    %c0_i32_1 = arith.constant 0 : i32
    return %c0_i32, %c0_i32_0 : i32, i32
  }
  func.func @transform_8(%arg0: i32) -> (i32, i32) {
    %c0_i32 = arith.constant 0 : i32
    %c0_i32_0 = arith.constant 0 : i32
    return %arg0, %c0_i32 : i32, i32
  }
}

</mosaic_0001>

<bundles_post_ra>
// kernel: tpu_custom_call.1
= control target key start
LH: loop header
LB: loop body
LE: loop exit
PB: predicated region body
PF: predicated region fallthrough
CT: control target
= control target key end

     0   :  { %s980_s0 = inlined_call_operand.vmem [shape: s32[128,1], index: 0, kind: input, shape index: {}]   ;;  %s981_s1 = inlined_call_operand.vmem [shape: bf16[16,128], index: 1, kind: input, shape index: {}]   ;;  %s982_s2 = inlined_call_operand.vmem [shape: bf16[64,32], index: 2, kind: input, shape index: {}]   ;;  %s983_s3 = inlined_call_operand.vmem [shape: f32[1,32], index: 3, kind: input, shape index: {}]   ;;  %s984_s4 = inlined_call_operand.vmem [shape: bf16[96,32], index: 4, kind: input, shape index: {}]   ;;  %s985_s5 = inlined_call_operand.vmem [shape: f32[1,32], index: 5, kind: input, shape index: {}]   ;;  %s986_s6 = inlined_call_operand.vmem [shape: f32[1,32], index: 6, kind: input, shape index: {}]   ;;  %s987_s7 = inlined_call_operand.<no memory space> [shape: f32[1,1], index: 7, kind: input, shape index: {}]   ;;  %s988_s8 = inlined_call_operand.hbm [shape: f32[8,128], index: 8, kind: output, shape index: {}]  }
   0x1   :  { %v13_v0 = vstv %s987_s7 }
   0x2   :  { %14 = vst [vmem:[#allocation2] sm:$0x1] %v13_v0 }
   0x3   :  { %v35_v1 = vld [vmem:[%s980_s0 + $0x10] sm:$0xff]  ;;  %v33_v2 = vld [vmem:[%s980_s0] sm:$0xff]  ;;  %v745_v3 = vmov 0   ;;  %v36_v4 = vld [vmem:[%s980_s0 + $0x18] sm:$0xff]  ;;  %v746_v6 = vmov 0.0  }
   0x4   :  { %677 = vset.pattern.permute.xlu1 %v745_v3  ;;  %676 = vset.pattern.permute.xlu0 %v745_v3  ;;  %v34_v5 = vld [vmem:[%s980_s0 + $0x8] sm:$0xff]  ;;  %v37_v8 = vld [vmem:[%s980_s0 + $0x20] sm:$0xff]  ;;  %v40_v11 = vld [vmem:[%s980_s0 + $0x38] sm:$0xff] }
   0x5   :  { %58 = vperm.xlu1 %677, %v35_v1   ;;  %52 = vperm.xlu0 %676, %v33_v2   ;;  %v38_v7 = vld [vmem:[%s980_s0 + $0x28] sm:$0xff]  ;;  %v678_v9 = vld [vmem:[%s982_s2] sm:$0xff]   ;;  %v39_v12 = vld [vmem:[%s980_s0 + $0x30] sm:$0xff] }
   0x6   :  { %634 = vmatprep.subr.bf16.mxu1 %v746_v6  ;;  %v679_v10 = vld [vmem:[%s982_s2 + $0x8] sm:$0xff]   ;;  %610 = vmatprep.subr.bf16.mxu0 %v678_v9  ;;  %v680_v13 = vld [vmem:[%s982_s2 + $0x10] sm:$0xff]  }
   0x7   :  { %611 = vmatpush3.bf16.msra.mxu0 %v678_v9 }
   0x8   :  { %612 = vmatprep.subr.bf16.mxu0 %v679_v10 }
   0x9   :  { %61 = vperm.xlu1 %677, %v36_v4   ;;  %55 = vperm.xlu0 %676, %v34_v5  }
   0xb   :  { %613 = vmatpush3.bf16.msra.mxu0 %v679_v10 }
   0xd   :  { %67 = vperm.xlu1 %677, %v38_v7   ;;  %64 = vperm.xlu0 %676, %v37_v8  }
  0x11   :  { %73 = vperm.xlu1 %677, %v40_v11   ;;  %70 = vperm.xlu0 %676, %v39_v12  }
  0x12   :  { %15 = vsyncpa [#allocation4], 0  ;;  %v42_v14 = vld [vmem:[%s980_s0 + $0x48] sm:$0xff]  ;;  %v41_v15 = vld [vmem:[%s980_s0 + $0x40] sm:$0xff]  ;;  %614 = vmatprep.subr.bf16.mxu0 %v680_v13  ;;  %v49_v23 = vlaneseq  ;;  %vm194_vm4 = vcmask 523264   ;;  %s748_s13 = smov 32  }
  0x13   :  { %v681_v16 = vld [vmem:[%s982_s2 + $0x18] sm:$0xff]   ;;  %615 = vmatpush3.bf16.msra.mxu0 %v680_v13  ;;  %v43_v18 = vld [vmem:[%s980_s0 + $0x50] sm:$0xff]  ;;  %v46_v19 = vld [vmem:[%s980_s0 + $0x68] sm:$0xff]  ;;  %s749_s7 = smov 64   ;;  %s750_s2 = smov [#allocation3]  }
  0x14   :  { %v44_v17 = vld [vmem:[%s980_s0 + $0x58] sm:$0xff]  ;;  %616 = vmatprep.subr.bf16.mxu0 %v681_v16  ;;  %v45_v20 = vld [vmem:[%s980_s0 + $0x60] sm:$0xff]  ;;  %v47_v22 = vld [vmem:[%s980_s0 + $0x70] sm:$0xff]  ;;  %v861_v24 = vand.u32 127, %v49_v23 }
  0x15   :  { %79 = vperm.xlu1 %677, %v42_v14   ;;  %76 = vperm.xlu0 %676, %v41_v15   ;;  %v48_v21 = vld [vmem:[%s980_s0 + $0x78] sm:$0xff]  ;;  %v908_v1 = vld [vmem:[%s983_s3] ss:$0 sm:$0xff] }
  0x17   :  { %617 = vmatpush3.bf16.msra.mxu0 %v681_v16 }
  0x18   :  { %654 = vmatprep.subr.bf16.mxu0 %v746_v6 }
  0x19   :  { %85 = vperm.xlu1 %677, %v44_v17   ;;  %82 = vperm.xlu0 %676, %v43_v18  }
  0x1d   :  { %91 = vperm.xlu1 %677, %v46_v19   ;;  %88 = vperm.xlu0 %676, %v45_v20  }
  0x21   :  { %97 = vperm.xlu1 %677, %v48_v21   ;;  %94 = vperm.xlu0 %676, %v47_v22  }
  0x84   :  { %v59_v25 = vpop.permute.xlu1 %58  ;;  %v53_v26 = vpop.permute.xlu0 %52 }
  0x85   :  { %vm101_vm0 = vcmp.eq.s32.totalorder %v59_v25, %v861_v24  ;;  %vm99_vm1 = vcmp.eq.s32.totalorder %v53_v26, %v861_v24 }
  0x86   :  { %v544_v29 = vsel %vm101_vm0, 1.0, %v746_v6  ;;  %v542_v30 = vsel %vm99_vm1, 1.0, %v746_v6  ;;  %vm747_vm1 = vmmov 0  }
  0x87   :  { %650 = vmatprep.mubr.msk.bf16.mxu1 %vm747_vm1, %v746_v6 }
  0x88   :  { %v62_v27 = vpop.permute.xlu1 %61  ;;  %v56_v28 = vpop.permute.xlu0 %55 }
  0x89   :  { %vm102_vm2 = vcmp.eq.s32.totalorder %v62_v27, %v861_v24  ;;  %vm100_vm3 = vcmp.eq.s32.totalorder %v56_v28, %v861_v24 }
  0x8a   :  { %v545_v31 = vsel %vm102_vm2, 1.0, %v746_v6  ;;  %v543_v32 = vsel %vm100_vm3, 1.0, %v746_v6  ;;  %vm399_vm2 = vcmask 261120   ;;  %vm458_vm3 = vcmask 785408  }
  0x8b   :  { %v148_v33 = vpack.c.bf16 %v545_v31, %v544_v29  ;;  %v147_v34 = vpack.c.bf16 %v543_v32, %v542_v30 }
  0x8c   :  { %v68_v35 = vpop.permute.xlu1 %67  ;;  %v65_v36 = vpop.permute.xlu0 %64 }
  0x8d   :  { %vm104_vm5 = vcmp.eq.s32.totalorder %v68_v35, %v861_v24  ;;  %vm103_vm6 = vcmp.eq.s32.totalorder %v65_v36, %v861_v24  ;;  %618 = vmatprep.mubr.msk.bf16.mxu0 %vm194_vm4, %v147_v34 }
  0x8e   :  { %v547_v37 = vsel %vm104_vm5, 1.0, %v746_v6  ;;  %v546_v38 = vsel %vm103_vm6, 1.0, %v746_v6  ;;  %619 = vmatmul.mubr.msk.bf16.vlgmr.msra.gmra.mrb[0].mxu0 %vm194_vm4, %v148_v33 }
  0x8f   :  { %v149_v39 = vpack.c.bf16 %v547_v37, %v546_v38 }
  0x90   :  { %v74_v40 = vpop.permute.xlu1 %73  ;;  %v71_v41 = vpop.permute.xlu0 %70 }
  0x91   :  { %vm106_vm7 = vcmp.eq.s32.totalorder %v74_v40, %v861_v24  ;;  %vm105_vm8 = vcmp.eq.s32.totalorder %v71_v41, %v861_v24  ;;  %622 = vmatprep.mubr.msk.bf16.mxu0 %vm194_vm4, %v149_v39 }
  0x92   :  { %v549_v42 = vsel %vm106_vm7, 1.0, %v746_v6  ;;  %v548_v43 = vsel %vm105_vm8, 1.0, %v746_v6 }
  0x93   :  { %v150_v44 = vpack.c.bf16 %v549_v42, %v548_v43 }
  0x94   :  { %v80_v45 = vpop.permute.xlu1 %79  ;;  %v77_v46 = vpop.permute.xlu0 %76 }
  0x95   :  { %vm108_vm9 = vcmp.eq.s32.totalorder %v80_v45, %v861_v24  ;;  %vm107_vm10 = vcmp.eq.s32.totalorder %v77_v46, %v861_v24 }
  0x96   :  { %v551_v47 = vsel %vm108_vm9, 1.0, %v746_v6  ;;  %v550_v48 = vsel %vm107_vm10, 1.0, %v746_v6  ;;  %623 = vmatmul.mubr.msk.bf16.gmra.mrb[4].mxu0 %vm194_vm4, %v150_v44 }
  0x97   :  { %v151_v49 = vpack.c.bf16 %v551_v47, %v550_v48 }
  0x98   :  { %v86_v50 = vpop.permute.xlu1 %85  ;;  %v83_v51 = vpop.permute.xlu0 %82 }
  0x99   :  { %vm110_vm11 = vcmp.eq.s32.totalorder %v86_v50, %v861_v24  ;;  %vm109_vm12 = vcmp.eq.s32.totalorder %v83_v51, %v861_v24  ;;  %626 = vmatprep.mubr.msk.bf16.mxu0 %vm194_vm4, %v151_v49 }
  0x9a   :  { %v553_v52 = vsel %vm110_vm11, 1.0, %v746_v6  ;;  %v552_v53 = vsel %vm109_vm12, 1.0, %v746_v6 }
  0x9b   :  { %v152_v54 = vpack.c.bf16 %v553_v52, %v552_v53 }
  0x9c   :  { %v92_v55 = vpop.permute.xlu1 %91  ;;  %v89_v56 = vpop.permute.xlu0 %88 }
  0x9d   :  { %vm112_vm13 = vcmp.eq.s32.totalorder %v92_v55, %v861_v24  ;;  %vm111_vm14 = vcmp.eq.s32.totalorder %v89_v56, %v861_v24 }
  0x9e   :  { %v555_v57 = vsel %vm112_vm13, 1.0, %v746_v6  ;;  %v554_v58 = vsel %vm111_vm14, 1.0, %v746_v6  ;;  %627 = vmatmul.mubr.msk.bf16.gmra.mrb[8].mxu0 %vm194_vm4, %v152_v54 }
  0x9f   :  { %v153_v59 = vpack.c.bf16 %v555_v57, %v554_v58 }
  0xa0   :  { %v98_v60 = vpop.permute.xlu1 %97  ;;  %v95_v61 = vpop.permute.xlu0 %94 }
  0xa1   :  { %vm114_vm15 = vcmp.eq.s32.totalorder %v98_v60, %v861_v24  ;;  %vm113_vm0 = vcmp.eq.s32.totalorder %v95_v61, %v861_v24  ;;  %630 = vmatprep.mubr.msk.bf16.mxu0 %vm194_vm4, %v153_v59  ;;  %v682_v59 = vld [vmem:[%s981_s1] sm:$0xff]   ;;  %v684_v61 = vld [vmem:[%s984_s4 + $0x8] sm:$0xff]  }
  0xa2   :  { %v557_v62 = vsel %vm114_vm15, 1.0, %v746_v6  ;;  %v556_v63 = vsel %vm113_vm0, 1.0, %v746_v6  ;;  %v683_v60 = vld [vmem:[%s984_s4] sm:$0xff]  }
  0xa3   :  { %v154_v0 = vpack.c.bf16 %v557_v62, %v556_v63  ;;  %655 = vmatpush3.bf16.msra.mxu0 %v683_v60  ;;  %v685_v62 = vld [vmem:[%s984_s4 + $0x10] sm:$0xff]   ;;  %v686_v63 = vld [vmem:[%s984_s4 + $0x18] sm:$0xff]  }
  0xa4   :  { %656 = vmatprep.subr.bf16.mxu0 %v746_v6 }
  0xa6   :  { %631 = vmatmul.mubr.msk.bf16.gmra.mrb[12].mxu0 %vm194_vm4, %v154_v0  ;;  %v687_v0 = vld [vmem:[%s984_s4 + $0x20] sm:$0xff]  }
  0xa7   :  { %666 = vmatprep.mubr.msk.bf16.mxu0 %vm747_vm1, %v746_v6  ;;  %657 = vmatpush3.bf16.msra.mxu0 %v684_v61 }
  0xa8   :  { %658 = vmatprep.subr.bf16.mxu0 %v746_v6 }
  0xab   :  { %659 = vmatpush3.bf16.msra.mxu0 %v685_v62 }
  0xac   :  { %660 = vmatprep.subr.bf16.mxu0 %v746_v6 }
  0xaf   :  { %661 = vmatpush3.bf16.msra.mxu0 %v686_v63 }
  0xb0   :  { %662 = vmatprep.subr.bf16.mxu0 %v746_v6 }
  0xb3   :  { %663 = vmatpush3.bf16.msra.mxu0 %v687_v0 }
  0xb4   :  { %664 = vmatprep.subr.bf16.mxu0 %v746_v6 }
 0x161   :  { %v620_v2 = vpop.f32.mrb[0].mxu0 }
 0x162   :  { %v262_v3 = vadd.f32 %v620_v2, %v908_v1  ;;  %v253_v4 = vpop.f32.mrb[1].mxu0 }
 0x163   :  { %v254_v5 = vadd.f32 %v908_v1, %v253_v4  ;;  %v621_v7 = vpop.f32.mrb[2].mxu0 }
 0x164   :  { %689 = vtanh.f32 %v262_v3  ;;  %v265_v8 = vadd.f32 %v621_v7, %v908_v1  ;;  %v256_v9 = vpop.f32.mrb[3].mxu0 }
 0x165   :  { %691 = vtanh.f32 %v254_v5  ;;  %v257_v10 = vadd.f32 %v908_v1, %v256_v9 }
 0x166   :  { %693 = vtanh.f32 %v265_v8 }
 0x167   :  { %695 = vtanh.f32 %v257_v10 }
 0x169   :  { %v624_v11 = vpop.f32.mrb[4].mxu0 }
 0x16a   :  { %v278_v12 = vadd.f32 %v624_v11, %v908_v1  ;;  %v269_v13 = vpop.f32.mrb[5].mxu0 }
 0x16b   :  { %v270_v14 = vadd.f32 %v908_v1, %v269_v13  ;;  %v625_v15 = vpop.f32.mrb[6].mxu0  ;;  %v572_v13 = vld [vmem:[%s985_s5] ss:$0 sm:$0xff]  ;;  %s534_s5 = sshll.u32 %s750_s2, 4  ;;  %s535_s5 = int_to_ptr.vmem [resolvable:$true] %s534_s5 }
 0x16c   :  { %697 = vtanh.f32 %v278_v12  ;;  %v281_v16 = vadd.f32 %v625_v15, %v908_v1  ;;  %v272_v17 = vpop.f32.mrb[7].mxu0  ;;  %s721_s17 = scalar_lea.vmem %s535_s5, 128  ;;  %p726_p1 = scmp.lt.s32.totalorder %s535_s5, %s535_s5 }
 0x16d   :  { %699 = vtanh.f32 %v270_v14  ;;  %v273_v18 = vadd.f32 %v908_v1, %v272_v17  ;;  %p722_p0 = scmp.ne.s32.totalorder %s535_s5, %s721_s17  ;;  %p727_p2 = scmp.lt.s32.totalorder %s721_s17, %s721_s17 }
 0x16e   :  { %v690_v19 = vpop.eup %689  ;;  %701 = vtanh.f32 %v281_v16 }
 0x16f   :  { %v692_v20 = vpop.eup %691  ;;  %703 = vtanh.f32 %v273_v18  ;;  %v580_v18 = vld [vmem:[%s986_s6] ss:$0 sm:$0xff]  ;;  %p728_p3 = por %p727_p2, %p726_p1 }
 0x170   :  { %v694_v21 = vpop.eup %693 }
 0x171   :  { %v696_v22 = vpop.eup %695  ;;  %v628_v23 = vpop.f32.mrb[8].mxu0  ;;  %v335_v24 = vpack.c.bf16 %v694_v21, %v690_v19  ;;  %p729_p4 = pnand %p728_p3, %p722_p0 }
 0x172   :  { %v294_v25 = vadd.f32 %v628_v23, %v908_v1  ;;  %v285_v26 = vpop.f32.mrb[9].mxu0  ;;  %v334_v27 = vpack.c.bf16 %v696_v22, %v692_v20  ;;  %v581_v23 = vld [vmem:[#allocation2] ss:$0 sm:$0xff] }
 0x173   :  { %v286_v28 = vadd.f32 %v908_v1, %v285_v26  ;;  %v629_v29 = vpop.f32.mrb[10].mxu0 }
 0x174   :  { %705 = vtanh.f32 %v294_v25  ;;  %v297_v30 = vadd.f32 %v629_v29, %v908_v1  ;;  %v288_v31 = vpop.f32.mrb[11].mxu0  ;;  %635 = vmatpush3.bf16.msra.mxu1 %v334_v27 }
 0x175   :  { %707 = vtanh.f32 %v286_v28  ;;  %v289_v32 = vadd.f32 %v908_v1, %v288_v31  ;;  %636 = vmatprep.subr.bf16.mxu1 %v746_v6 }
 0x176   :  { %v698_v33 = vpop.eup %697  ;;  %709 = vtanh.f32 %v297_v30 }
 0x177   :  { %v700_v34 = vpop.eup %699  ;;  %711 = vtanh.f32 %v289_v32 }
 0x178   :  { %v702_v35 = vpop.eup %701  ;;  %637 = vmatpush3.bf16.msra.mxu1 %v335_v24 }
 0x179   :  { %v704_v36 = vpop.eup %703  ;;  %v632_v37 = vpop.f32.mrb[12].mxu0  ;;  %638 = vmatprep.subr.bf16.mxu1 %v746_v6  ;;  %v337_v38 = vpack.c.bf16 %v702_v35, %v698_v33 }
 0x17a   :  { %v310_v39 = vadd.f32 %v632_v37, %v908_v1  ;;  %v301_v40 = vpop.f32.mrb[13].mxu0  ;;  %v336_v41 = vpack.c.bf16 %v704_v36, %v700_v34 }
 0x17b   :  { %v302_v42 = vadd.f32 %v908_v1, %v301_v40  ;;  %v633_v43 = vpop.f32.mrb[14].mxu0 }
 0x17c   :  { %713 = vtanh.f32 %v310_v39  ;;  %v313_v44 = vadd.f32 %v633_v43, %v908_v1  ;;  %v304_v45 = vpop.f32.mrb[15].mxu0  ;;  %639 = vmatpush3.bf16.msra.mxu1 %v336_v41 }
 0x17d   :  { %715 = vtanh.f32 %v302_v42  ;;  %v305_v46 = vadd.f32 %v908_v1, %v304_v45  ;;  %640 = vmatprep.subr.bf16.mxu1 %v746_v6  ;;  %v688_v1 = vld [vmem:[%s984_s4 + $0x28] sm:$0xff]  }
 0x17e   :  { %v706_v47 = vpop.eup %705  ;;  %717 = vtanh.f32 %v313_v44  ;;  %665 = vmatpush3.bf16.msra.mxu0 %v688_v1 }
 0x17f   :  { %v708_v48 = vpop.eup %707  ;;  %719 = vtanh.f32 %v305_v46 }
 0x180   :  { %v710_v49 = vpop.eup %709  ;;  %641 = vmatpush3.bf16.msra.mxu1 %v337_v38 }
 0x181   :  { %v712_v50 = vpop.eup %711  ;;  %642 = vmatprep.subr.bf16.mxu1 %v746_v6  ;;  %v339_v51 = vpack.c.bf16 %v710_v49, %v706_v47 }
 0x182   :  { %v338_v52 = vpack.c.bf16 %v712_v50, %v708_v48 }
 0x184   :  { %643 = vmatpush3.bf16.msra.mxu1 %v338_v52 }
 0x185   :  { %644 = vmatprep.subr.bf16.mxu1 %v746_v6 }
 0x186   :  { %v714_v53 = vpop.eup %713 }
 0x187   :  { %v716_v54 = vpop.eup %715 }
 0x188   :  { %v718_v55 = vpop.eup %717  ;;  %645 = vmatpush3.bf16.msra.mxu1 %v339_v51 }
 0x189   :  { %v720_v56 = vpop.eup %719  ;;  %646 = vmatprep.subr.bf16.mxu1 %v746_v6  ;;  %v341_v57 = vpack.c.bf16 %v718_v55, %v714_v53 }
 0x18a   :  { %v340_v58 = vpack.c.bf16 %v720_v56, %v716_v54 }
 0x18c   :  { %647 = vmatpush3.bf16.msra.mxu1 %v340_v58 }
 0x18d   :  { %648 = vmatprep.subr.bf16.mxu1 %v746_v6 }
 0x190   :  { %649 = vmatpush3.bf16.msra.mxu1 %v341_v57 }
 0x193   :  { %651 = vmatmul.mubr.bf16.vlgmr.msra.gmra.mrb[0].mxu1 %v682_v59 }
 0x266   :  { %v382_v2 = vpop.f32.mrb[0].mxu1 }
 0x267   :  { %v652_v3 = vpop.f32.mrb[1].mxu1 }
 0x268   :  { %v385_v4 = vpop.f32.mrb[2].mxu1 }
 0x269   :  { %v389_v5 = vsub.f32 %v382_v2, %v385_v4  ;;  %392 = vrot.lane.b32.xlu0 %v385_v4, %s748_s13  ;;  %v653_v7 = vpop.f32.mrb[3].mxu1 }
 0x26b   :  { %v390_v8 = vand.u32 2147483647, %v389_v5 }
 0x26d   :  { %396 = vrot.lane.b32.xlu1 %v390_v8, %s749_s7 }
 0x2db   :  { %v393_v9 = vpop.permute.xlu0 %392 }
 0x2dc   :  { %v400_v10 = vsel %vm399_vm2, %v382_v2, %v393_v9 }
 0x2df   :  { %v397_v6 = vpop.permute.xlu1 %396 }
 0x2e0   :  { %v401_v11 = vsel %vm194_vm4, %v400_v10, %v397_v6 }
 0x2e1   :  { %v402_v12 = vpack.c.bf16 %v401_v11, %v401_v11 }
 0x2e3   :  { %667 = vmatmul.mubr.msk.bf16.vlgmr.msra.gmra.mrb[16].mxu0 %vm458_vm3, %v402_v12 }
 0x3b6   :  { %v496_v14 = vpop.f32.mrb[16].mxu0 }
 0x3b7   :  { %v497_v15 = vadd.f32 %v572_v13, %v496_v14  ;;  %v668_v16 = vpop.f32.mrb[17].mxu0 }
 0x3b8   :  { %v499_v17 = vpop.f32.mrb[18].mxu0 }
 0x3b9   :  { %v502_v19 = vmax.f32 %v497_v15, 0.0  ;;  %v669_v20 = vpop.f32.mrb[19].mxu0 }
 0x3bb   :  { %v510_v21 = vmul.f32 %v580_v18, %v502_v19 }
 0x3bd   :  { %v511_v22 = vsel %vm399_vm2, %v510_v21, 0.0 }
 0x3be   :  { %512 = vadd.xlane.f32.xlu0 %v511_v22 }
 0x44b   :  { %v513_v24 = vpop.xlane.xlu0 %512 }
 0x44c   :  { %v521_v25 = vadd.f32 %v581_v23, %v513_v24 }
 0x44e   :  { %524 = vperm.xlu1 %677, %v521_v25  }
 0x4cd   :  { %v525_v26 = vpop.permute.xlu1 %524 }
 0x4ce   :  { %527 = vst [vmem:[#allocation3] sm:$0xff] %v525_v26 }
 0x4cf   :  { %732 = shalt.err (!%p729_p4)
}
 0x4d0   :  { %s733_s19 = scalar_lea.hbm %s988_s8, 128 }
 0x4d1   :  { %p734_p5 = scmp.ne.s32.totalorder %s988_s8, %s733_s19  ;;  %p737_p6 = scmp.lt.u32.totalorder %s733_s19, %s988_s8 }
 0x4d3   :  { %p739_p7 = pnand %p737_p6, %p734_p5 }
 0x4d5   :  { %742 = shalt.err (!%p739_p7)
}
 0x4d6   :  { %537 = dma.vmem_to_hbm [thread:$0]  %s535_s5, 128, %s988_s8, [#allocation4]  }
 0x4d7   :  { %743 = dma.done.wait [#allocation4], 128  }
 0x4d8   :  { %744 = vsyncadd [#allocation4], 4294967168 }
 0x4d9   :  { %541 = vsyncpa [#allocation4], 1 }

</bundles_post_ra>
